<compile_context>
chip_gen: v7x
topology: tpu7x:2x2x1
jax: 0.10.0
libtpu: 0.0.40
codegen_flags: <defaults>
</compile_context>

<pallas_src>
import functools

import numpy as np

import jax
import jax.numpy as jnp
from jax import lax
from jax.experimental import pallas as pl
from jax.experimental.pallas import tpu as pltpu

_LANE = 128
_SUBLANE = 8


def _round_up(x: int, m: int) -> int:
    return ((x + m - 1) // m) * m


def quantile_loss_ref(preds, target, quantiles):
    """Pure-JAX reference mirroring the PyTorch loop."""
    preds = preds.astype(jnp.float32)
    target = target.astype(jnp.float32)
    q = jnp.asarray(quantiles, dtype=jnp.float32)[None, :]   # (1, Q)
    errors = target[:, None] - preds                          # (B, Q)
    per = jnp.maximum((q - 1.0) * errors, q * errors)
    return jnp.mean(jnp.sum(per, axis=1))


def _quantile_loss_kernel(preds_ref, target_ref, emat_ref, out_ref, acc_ref, *,
                          q_values, n_valid_rows, tile_rows):
    c = pl.program_id(0)                  # megacore part
    i = pl.program_id(1)                  # batch-tile within the part
    n_inner = pl.num_programs(1)
    n_q = len(q_values)
    lanes = _LANE * n_q

    @pl.when(i == 0)
    def _init():
        acc_ref[...] = jnp.zeros_like(acc_ref)

    # Lane-periodic quantile coefficients, baked from the static Python floats.
    lane_q = lax.broadcasted_iota(jnp.int32, (1, lanes), 1) % n_q
    q_row = jnp.full((1, lanes), q_values[-1], dtype=jnp.float32)
    for k in range(n_q - 1):
        q_row = jnp.where(lane_q == k, q_values[k], q_row)
    qm1_row = q_row - 1.0

    # Exact f32 lane-expansion of target (each batch value repeated n_q times
    # along lanes) on the idle MXU: t32 == t_hi + t_mid + t_lo exactly (three
    # non-overlapping bf16 chunks), and emat is a 0/1 bf16 matrix, so every
    # output element accumulates exactly hi+mid+lo -> bit-exact expansion.
    t32 = target_ref[...].astype(jnp.float32)                  # (tile_rows, 128)
    t_hi = t32.astype(jnp.bfloat16)
    r1 = t32 - t_hi.astype(jnp.float32)
    t_mid = r1.astype(jnp.bfloat16)
    r2 = r1 - t_mid.astype(jnp.float32)
    t_lo = r2.astype(jnp.bfloat16)
    t_chunks = jnp.concatenate([t_hi, t_mid, t_lo], axis=1)    # (tile_rows, 384)
    t_exp = jnp.dot(t_chunks, emat_ref[...],
                    preferred_element_type=jnp.float32)        # (tile_rows, lanes)

    preds = preds_ref[...].astype(jnp.float32)                 # (tile_rows, lanes)
    errors = t_exp - preds
    per_elem = jnp.maximum(qm1_row * errors, q_row * errors)

    tile_idx = c * n_inner + i
    rows_left = n_valid_rows - tile_idx * tile_rows

    # Common path: full tile, pure VPU accumulate (no mask work).
    @pl.when(rows_left >= tile_rows)
    def _acc_full():
        acc_ref[...] += per_elem

    # Rare path: the single partial tile -- mask rows past the padded array
    # (Pallas edge-block garbage).  Dead overhang tiles (rows_left <= 0, only
    # possible with the megacore split) are skipped entirely.
    @pl.when(jnp.logical_and(rows_left > 0, rows_left < tile_rows))
    def _acc_partial():
        row_ids = lax.broadcasted_iota(jnp.int32, (tile_rows, lanes), 0)
        acc_ref[...] += jnp.where(row_ids < rows_left, per_elem, 0.0)

    @pl.when(i == n_inner - 1)
    def _finalize():
        # Single XLU reduction per part, once at the very end.
        out_ref[...] = jnp.full(out_ref.shape, jnp.sum(acc_ref[...]),
                                dtype=jnp.float32)


def quantile_loss(preds, target, quantiles, *, use_pallas=None,
                  max_tile_rows=None, vmem_budget_bytes=12 * 1024 * 1024):
    """preds: (B, Q) float, target: (B,) float, quantiles: list of floats."""
    B, n_q = preds.shape
    assert target.shape == (B,), "preds.shape[0] must match target.shape[0]"
    q_values = tuple(float(q) for q in quantiles)
    assert len(q_values) == n_q

    # Small-problem fast path: the kernel launch would be pure overhead.
    if use_pallas is None:
        use_pallas = (B * n_q) >= 65536
    if not use_pallas:
        return quantile_loss_ref(preds, target, q_values)

    lanes = _LANE * n_q

    # Pad batch to a multiple of 128 (and at least 8*128) with zeros; padded
    # (pred=0, target=0) pairs contribute exactly 0 to the sum.  B % 128 == 0
    # and B >= 1024 (the perf-relevant case) needs no pad -> no extra HBM pass.
    b_pad = max(_round_up(B, _LANE), _LANE * _SUBLANE)
    if b_pad != B:
        preds = jnp.pad(preds, ((0, b_pad - B), (0, 0)))
        target = jnp.pad(target, ((0, b_pad - B),))
    n_rows = b_pad // _LANE

    # Free, row-major reshapes: batch stays in memory order, quantiles are
    # lane-interleaved with period n_q.  No transpose.
    # TODO(synk): if the upstream producer can hand preds in already as a flat
    # (B/128, 128*Q) slab, even this reshape disappears from the graph.
    preds2d = preds.reshape(n_rows, lanes)
    target2d = target.reshape(n_rows, _LANE)

    # 0/1 expansion matrix (exactly representable in bf16), stacked 3x for the
    # hi/mid/lo chunks.  Fetched once (constant index_map), ~384*128*Q*2 bytes.
    e = np.zeros((_LANE, lanes), dtype=np.float32)
    e[np.arange(lanes) // n_q, np.arange(lanes)] = 1.0
    emat = jnp.asarray(np.concatenate([e, e, e], axis=0), dtype=jnp.bfloat16)

    # Padded-layout-aware VMEM sizing: 2 pipeline buffers per input + f32 acc
    # + f32 temporaries (t_exp / per_elem) + bf16 chunks.
    p_isz = jnp.dtype(preds.dtype).itemsize
    t_isz = jnp.dtype(target.dtype).itemsize
    per_row_bytes = (2 * lanes * p_isz + 2 * _LANE * t_isz
                     + lanes * 4
                     + 2 * lanes * 4
                     + 3 * _LANE * 2 + 2 * _LANE * 4)
    tile_rows = (vmem_budget_bytes // per_row_bytes) // _SUBLANE * _SUBLANE
    if max_tile_rows is not None:
        tile_rows = min(tile_rows, _round_up(max_tile_rows, _SUBLANE))
    tile_rows = max(_SUBLANE, min(tile_rows, n_rows))

    n_tiles = pl.cdiv(n_rows, tile_rows)
    n_parts = 2 if n_tiles >= 2 else 1          # v7x megacore split; harmless on 1-TC chips
    tiles_per_part = pl.cdiv(n_tiles, n_parts)

    kernel = functools.partial(
        _quantile_loss_kernel,
        q_values=q_values, n_valid_rows=n_rows, tile_rows=tile_rows)

    def _tile_map(c, i):
        # Clamp so overhang steps of the second part re-read a valid block
        # (their contribution is skipped in-kernel).
        return (jnp.minimum(c * tiles_per_part + i, n_tiles - 1), 0)

    out = pl.pallas_call(
        kernel,
        out_shape=jax.ShapeDtypeStruct((n_parts * _SUBLANE, _LANE), jnp.float32),
        grid_spec=pltpu.PrefetchScalarGridSpec(
            num_scalar_prefetch=0,
            grid=(n_parts, tiles_per_part),
            in_specs=[
                pl.BlockSpec((tile_rows, lanes), _tile_map),          # preds (interleaved)
                pl.BlockSpec((tile_rows, _LANE), _tile_map),          # target
                pl.BlockSpec((3 * _LANE, lanes), lambda c, i: (0, 0)),  # expansion matrix
            ],
            out_specs=pl.BlockSpec((_SUBLANE, _LANE), lambda c, i: (c, 0)),
            scratch_shapes=[pltpu.VMEM((tile_rows, lanes), jnp.float32)],
        ),
        compiler_params=pltpu.CompilerParams(
            dimension_semantics=("parallel", "arbitrary"),
            vmem_limit_bytes=32 * 1024 * 1024,
        ),
    )(preds2d, target2d, emat)

    partials = out[::_SUBLANE, 0]        # one partial sum per megacore part
    return jnp.sum(partials) / jnp.float32(B)


if __name__ == "__main__":
    quantiles = [0.1, 0.5, 0.9]
    n_q = len(quantiles)
    key = jax.random.PRNGKey(0)
    k1, k2, k3, k4 = jax.random.split(key, 4)

    # Case 1: typical small module shape, forced through the Pallas path.
    b1 = 16
    preds1 = jax.random.normal(k1, (b1, n_q), dtype=jnp.float32)
    target1 = jax.random.normal(k2, (b1,), dtype=jnp.float32)
    out1 = jax.block_until_ready(
        quantile_loss(preds1, target1, quantiles, use_pallas=True))
    ref1 = quantile_loss_ref(preds1, target1, quantiles)
    assert jnp.allclose(out1, ref1, rtol=1e-5, atol=1e-6), (out1, ref1)

    # Auto-dispatch (pure-JAX fast path at this tiny size) also matches.
    out1b = jax.block_until_ready(quantile_loss(preds1, target1, quantiles))
    assert jnp.allclose(out1b, ref1, rtol=1e-5, atol=1e-6), (out1b, ref1)

    # Case 2: multi-tile grid with a partial last tile and a dead overhang tile
    # on the second (megacore) part; exercises full / masked / skipped paths.
    b2 = 2560
    preds2 = jax.random.normal(k3, (b2, n_q), dtype=jnp.float32)
    target2 = jax.random.normal(k4, (b2,), dtype=jnp.float32)
    out2 = jax.block_until_ready(
        quantile_loss(preds2, target2, quantiles, use_pallas=True, max_tile_rows=8))
    ref2 = quantile_loss_ref(preds2, target2, quantiles)
    assert jnp.allclose(out2, ref2, rtol=1e-5, atol=1e-6), (out2, ref2)

    # Case 3: ragged batch + bf16 inputs (zero-pads internally, upcasts in-kernel).
    b3 = 1000
    preds3 = jax.random.normal(k1, (b3, n_q), dtype=jnp.bfloat16)
    target3 = jax.random.normal(k2, (b3,), dtype=jnp.bfloat16)
    out3 = jax.block_until_ready(
        quantile_loss(preds3, target3, quantiles, use_pallas=True))
    ref3 = quantile_loss_ref(preds3, target3, quantiles)
    assert jnp.allclose(out3, ref3, rtol=1e-4, atol=1e-4), (out3, ref3)

    print("KERNEL_OK")
</pallas_src>

<mosaic_0001>
module attributes {stable_mosaic.version = 11 : i64} {
  func.func @_quantile_loss_kernel(%arg0: i32, %arg1: i32, %arg2: memref<8x384xf32, #tpu.memory_space<vmem>>, %arg3: memref<8x128xf32, #tpu.memory_space<vmem>>, %arg4: memref<384x384xbf16, #tpu.memory_space<vmem>>, %arg5: memref<8x128xf32, #tpu.memory_space<vmem>>, %arg6: memref<8x384xf32, #tpu.memory_space<vmem>>) attributes {dimension_semantics = [#tpu.dimension_semantics<parallel>, #tpu.dimension_semantics<arbitrary>], iteration_bounds = array<i64: 1, 1>, scalar_prefetch = 0 : i64, scratch_operands = 1 : i64, tpu.core_type = #tpu.core_type<tc>, window_params = [{transform_indices = @transform_0, window_bounds = array<i64: 8, 384>}, {transform_indices = @transform_1, window_bounds = array<i64: 8, 128>}, {pipeline_mode = #tpu.pipeline_mode<synchronous>, transform_indices = @transform_2, window_bounds = array<i64: 384, 384>}, {transform_indices = @transform_3, window_bounds = array<i64: 8, 128>}]} {
    %c0_i32 = arith.constant 0 : i32
    %0 = arith.cmpi eq, %arg1, %c0_i32 : i32
    %1 = arith.extui %0 : i1 to i32
    %c0_i32_0 = arith.constant 0 : i32
    %2 = arith.cmpi ne, %1, %c0_i32_0 : i32
    scf.if %2 {
      %cst_25 = arith.constant 0.000000e+00 : f32
      %64 = vector.broadcast %cst_25 : f32 to vector<8x384xf32>
      %c0_26 = arith.constant 0 : index
      %c0_27 = arith.constant 0 : index
      %65 = vector.load %arg6[%c0_26, %c0_27] : memref<8x384xf32, #tpu.memory_space<vmem>>, vector<8x384xf32>
      tpu.vector_store %arg6[%c0_26, %c0_27], %64 {strides = array<i32>} : memref<8x384xf32, #tpu.memory_space<vmem>>, vector<8x384xf32>,
    } else {
    }
    %3 = tpu.iota {dimensions = array<i32: 1>} : vector<1x384xi32>
    %c3_i32 = arith.constant 3 : i32
    %c0_i32_1 = arith.constant 0 : i32
    %4 = arith.cmpi eq, %c3_i32, %c0_i32_1 : i32
    %c1_i32 = arith.constant 1 : i32
    %5 = arith.select %4, %c1_i32, %c3_i32 : i32
    %6 = vector.broadcast %5 : i32 to vector<1x384xi32>
    %7 = arith.remsi %3, %6 : vector<1x384xi32>
    %c0_i32_2 = arith.constant 0 : i32
    %8 = vector.broadcast %c0_i32_2 : i32 to vector<1x384xi32>
    %9 = arith.cmpi ne, %7, %8 : vector<1x384xi32>
    %c0_i32_3 = arith.constant 0 : i32
    %10 = vector.broadcast %c0_i32_3 : i32 to vector<1x384xi32>
    %11 = arith.cmpi slt, %7, %10 : vector<1x384xi32>
    %c0_i32_4 = arith.constant 0 : i32
    %12 = arith.cmpi slt, %5, %c0_i32_4 : i32
    %13 = vector.broadcast %12 : i1 to vector<1x384xi1>
    %14 = vector.broadcast %13 : vector<1x384xi1> to vector<1x384xi1>
    %15 = arith.xori %11, %14 : vector<1x384xi1>
    %16 = arith.andi %15, %9 : vector<1x384xi1>
    %17 = vector.broadcast %5 : i32 to vector<1x384xi32>
    %18 = arith.addi %7, %17 : vector<1x384xi32>
    %19 = arith.select %16, %18, %7 : vector<1x384xi1>, vector<1x384xi32>
    %cst = arith.constant 0.899999976 : f32
    %20 = vector.broadcast %cst : f32 to vector<1x384xf32>
    %c0_i32_5 = arith.constant 0 : i32
    %21 = vector.broadcast %c0_i32_5 : i32 to vector<1x384xi32>
    %22 = arith.cmpi eq, %19, %21 : vector<1x384xi32>
    %cst_6 = arith.constant 1.000000e-01 : f32
    %23 = vector.broadcast %cst_6 : f32 to vector<1x384xf32>
    %24 = arith.select %22, %23, %20 : vector<1x384xi1>, vector<1x384xf32>
    %c1_i32_7 = arith.constant 1 : i32
    %25 = vector.broadcast %c1_i32_7 : i32 to vector<1x384xi32>
    %26 = arith.cmpi eq, %19, %25 : vector<1x384xi32>
    %cst_8 = arith.constant 5.000000e-01 : f32
    %27 = vector.broadcast %cst_8 : f32 to vector<1x384xf32>
    %28 = arith.select %26, %27, %24 : vector<1x384xi1>, vector<1x384xf32>
    %cst_9 = arith.constant 1.000000e+00 : f32
    %29 = vector.broadcast %cst_9 : f32 to vector<1x384xf32>
    %30 = arith.subf %28, %29 : vector<1x384xf32>
    %c0 = arith.constant 0 : index
    %c0_10 = arith.constant 0 : index
    %31 = vector.load %arg3[%c0, %c0_10] : memref<8x128xf32, #tpu.memory_space<vmem>>, vector<8x128xf32>
    %32 = arith.truncf %31 : vector<8x128xf32> to vector<8x128xbf16>
    %33 = arith.extf %32 : vector<8x128xbf16> to vector<8x128xf32>
    %34 = arith.subf %31, %33 : vector<8x128xf32>
    %35 = arith.truncf %34 : vector<8x128xf32> to vector<8x128xbf16>
    %36 = arith.extf %35 : vector<8x128xbf16> to vector<8x128xf32>
    %37 = arith.subf %34, %36 : vector<8x128xf32>
    %38 = arith.truncf %37 : vector<8x128xf32> to vector<8x128xbf16>
    %39 = tpu.concatenate %32, %35, %38 in 1 : vector<8x128xbf16>, vector<8x128xbf16>, vector<8x128xbf16> -> vector<8x384xbf16>
    %c0_11 = arith.constant 0 : index
    %c0_12 = arith.constant 0 : index
    %40 = vector.load %arg4[%c0_11, %c0_12] : memref<384x384xbf16, #tpu.memory_space<vmem>>, vector<384x384xbf16>
    %cst_13 = arith.constant dense<0.000000e+00> : vector<8x384xf32>
    %41 = tpu.matmul %39, %40, %cst_13 {dimension_numbers = #tpu.dot_dimension_numbers<[1], [0], [0], [1], [0, 0, 1, 1], [], []>} : vector<8x384xbf16>, vector<384x384xbf16>, vector<8x384xf32> -> vector<8x384xf32>
    %c0_14 = arith.constant 0 : index
    %c0_15 = arith.constant 0 : index
    %42 = vector.load %arg2[%c0_14, %c0_15] : memref<8x384xf32, #tpu.memory_space<vmem>>, vector<8x384xf32>
    %43 = arith.subf %41, %42 : vector<8x384xf32>
    %44 = vector.broadcast %30 : vector<1x384xf32> to vector<8x384xf32>
    %45 = arith.mulf %44, %43 : vector<8x384xf32>
    %46 = vector.broadcast %28 : vector<1x384xf32> to vector<8x384xf32>
    %47 = arith.mulf %46, %43 : vector<8x384xf32>
    %48 = arith.maximumf %45, %47 : vector<8x384xf32>
    %c1_i32_16 = arith.constant 1 : i32
    %49 = arith.muli %arg0, %c1_i32_16 : i32
    %50 = arith.addi %49, %arg1 : i32
    %c8_i32 = arith.constant 8 : i32
    %51 = arith.muli %50, %c8_i32 : i32
    %c8_i32_17 = arith.constant 8 : i32
    %52 = arith.subi %c8_i32_17, %51 : i32
    %c8_i32_18 = arith.constant 8 : i32
    %53 = arith.cmpi sge, %52, %c8_i32_18 : i32
    %54 = arith.extui %53 : i1 to i32
    %c0_i32_19 = arith.constant 0 : i32
    %55 = arith.cmpi ne, %54, %c0_i32_19 : i32
    scf.if %55 {
      %c0_25 = arith.constant 0 : index
      %c0_26 = arith.constant 0 : index
      %64 = vector.load %arg6[%c0_25, %c0_26] : memref<8x384xf32, #tpu.memory_space<vmem>>, vector<8x384xf32>
      %65 = arith.addf %64, %48 : vector<8x384xf32>
      %c0_27 = arith.constant 0 : index
      %c0_28 = arith.constant 0 : index
      %66 = vector.load %arg6[%c0_27, %c0_28] : memref<8x384xf32, #tpu.memory_space<vmem>>, vector<8x384xf32>
      tpu.vector_store %arg6[%c0_27, %c0_28], %65 {strides = array<i32>} : memref<8x384xf32, #tpu.memory_space<vmem>>, vector<8x384xf32>,
    } else {
    }
    %c0_i32_20 = arith.constant 0 : i32
    %56 = arith.cmpi sgt, %52, %c0_i32_20 : i32
    %c8_i32_21 = arith.constant 8 : i32
    %57 = arith.cmpi slt, %52, %c8_i32_21 : i32
    %58 = arith.andi %56, %57 : i1
    %59 = arith.extui %58 : i1 to i32
    %c0_i32_22 = arith.constant 0 : i32
    %60 = arith.cmpi ne, %59, %c0_i32_22 : i32
    scf.if %60 {
      %64 = tpu.iota {dimensions = array<i32: 0>} : vector<8x384xi32>
      %c0_25 = arith.constant 0 : index
      %c0_26 = arith.constant 0 : index
      %65 = vector.load %arg6[%c0_25, %c0_26] : memref<8x384xf32, #tpu.memory_space<vmem>>, vector<8x384xf32>
      %66 = vector.broadcast %52 : i32 to vector<8x384xi32>
      %67 = arith.cmpi slt, %64, %66 : vector<8x384xi32>
      %cst_27 = arith.constant 0.000000e+00 : f32
      %68 = vector.broadcast %cst_27 : f32 to vector<8x384xf32>
      %69 = arith.select %67, %48, %68 : vector<8x384xi1>, vector<8x384xf32>
      %70 = arith.addf %65, %69 : vector<8x384xf32>
      %c0_28 = arith.constant 0 : index
      %c0_29 = arith.constant 0 : index
      %71 = vector.load %arg6[%c0_28, %c0_29] : memref<8x384xf32, #tpu.memory_space<vmem>>, vector<8x384xf32>
      tpu.vector_store %arg6[%c0_28, %c0_29], %70 {strides = array<i32>} : memref<8x384xf32, #tpu.memory_space<vmem>>, vector<8x384xf32>,
    } else {
    }
    %c0_i32_23 = arith.constant 0 : i32
    %61 = arith.cmpi eq, %arg1, %c0_i32_23 : i32
    %62 = arith.extui %61 : i1 to i32
    %c0_i32_24 = arith.constant 0 : i32
    %63 = arith.cmpi ne, %62, %c0_i32_24 : i32
    scf.if %63 {
      %c0_25 = arith.constant 0 : index
      %c0_26 = arith.constant 0 : index
      %64 = vector.load %arg6[%c0_25, %c0_26] : memref<8x384xf32, #tpu.memory_space<vmem>>, vector<8x384xf32>
      %65 = vector.shape_cast %64 : vector<8x384xf32> to vector<1x8x384xf32>
      %cst_27 = arith.constant dense<0.000000e+00> : vector<1xf32>
      %66 = vector.multi_reduction <add>, %65, %cst_27 [1, 2] : vector<1x8x384xf32> to vector<1xf32>
      %67 = vector.shape_cast %66 : vector<1xf32> to vector<1x1x1xf32>
      %68 = vector.extract %67[0, 0, 0] : f32 from vector<1x1x1xf32>
      %69 = vector.broadcast %68 : f32 to vector<8x128xf32>
      %c0_28 = arith.constant 0 : index
      %c0_29 = arith.constant 0 : index
      %70 = vector.load %arg5[%c0_28, %c0_29] : memref<8x128xf32, #tpu.memory_space<vmem>>, vector<8x128xf32>
      tpu.vector_store %arg5[%c0_28, %c0_29], %69 {strides = array<i32>} : memref<8x128xf32, #tpu.memory_space<vmem>>, vector<8x128xf32>,
    } else {
    }
    return
  }
  func.func @transform_0(%arg0: i32, %arg1: i32) -> (i32, i32) {
    %c1_i32 = arith.constant 1 : i32
    %0 = arith.muli %arg0, %c1_i32 : i32
    %1 = arith.addi %0, %arg1 : i32
    %c0_i32 = arith.constant 0 : i32
    %2 = arith.minsi %1, %c0_i32 : i32
    %c0_i32_0 = arith.constant 0 : i32
    %c0_i32_1 = arith.constant 0 : i32
    return %2, %c0_i32_0 : i32, i32
  }
  func.func @transform_1(%arg0: i32, %arg1: i32) -> (i32, i32) {
    %c1_i32 = arith.constant 1 : i32
    %0 = arith.muli %arg0, %c1_i32 : i32
    %1 = arith.addi %0, %arg1 : i32
    %c0_i32 = arith.constant 0 : i32
    %2 = arith.minsi %1, %c0_i32 : i32
    %c0_i32_0 = arith.constant 0 : i32
    %c0_i32_1 = arith.constant 0 : i32
    return %2, %c0_i32_0 : i32, i32
  }
  func.func @transform_2(%arg0: i32, %arg1: i32) -> (i32, i32) {
    %c0_i32 = arith.constant 0 : i32
    %c0_i32_0 = arith.constant 0 : i32
    %c0_i32_1 = arith.constant 0 : i32
    return %c0_i32, %c0_i32_0 : i32, i32
  }
  func.func @transform_3(%arg0: i32, %arg1: i32) -> (i32, i32) {
    %c0_i32 = arith.constant 0 : i32
    %c0_i32_0 = arith.constant 0 : i32
    return %arg0, %c0_i32 : i32, i32
  }
}

</mosaic_0001>

<bundles_post_ra>
// kernel: tpu_custom_call.1
= control target key start
LH: loop header
LB: loop body
LE: loop exit
PB: predicated region body
PF: predicated region fallthrough
CT: control target
= control target key end

     0   :  { %8 = vsyncpa [#allocation4], 0  ;;  %s1319_s0 = inlined_call_operand.hbm [shape: f32[8,384], index: 0, kind: input, shape index: {}]   ;;  %s1320_s1 = inlined_call_operand.hbm [shape: f32[8,128], index: 1, kind: input, shape index: {}]   ;;  %s1321_s2 = inlined_call_operand.hbm [shape: bf16[384,384], index: 2, kind: input, shape index: {}]   ;;  %s1322_s3 = inlined_call_operand.hbm [shape: f32[8,128], index: 3, kind: output, shape index: {}]  }
   0x1   :  { %9 = vsyncpa [#allocation7], 0 }
   0x2   :  { %10 = vsyncpa [#allocation5], 0  ;;  %s1224_s12 = smov [#allocation6]   ;;  %s1225_s14 = smov [#allocation3]  }
   0x3   :  { %s38_s13 = sshll.u32 %s1224_s12, 4  ;;  %s23_s15 = sshll.u32 %s1225_s14, 4  ;;  %s39_s13 = int_to_ptr.vmem [resolvable:$true] %s38_s13  ;;  %s24_s15 = int_to_ptr.vmem [resolvable:$true] %s23_s15 }
   0x4   :  { %s1130_s18 = scalar_lea.hbm %s1320_s1, 128 }
   0x5   :  { %p1131_p0 = scmp.ne.s32.totalorder %s1320_s1, %s1130_s18  ;;  %p1134_p1 = scmp.lt.u32.totalorder %s1130_s18, %s1320_s1 }
   0x7   :  { %p1136_p2 = pnand %p1134_p1, %p1131_p0 }
   0x9   :  { %1139 = shalt.err (!%p1136_p2)
}
   0xa   :  { %s1140_s23 = scalar_lea.vmem %s39_s13, 128  ;;  %p1145_p4 = scmp.lt.s32.totalorder %s39_s13, %s39_s13 }
   0xb   :  { %p1141_p3 = scmp.ne.s32.totalorder %s39_s13, %s1140_s23  ;;  %p1146_p5 = scmp.lt.s32.totalorder %s1140_s23, %s1140_s23 }
   0xd   :  { %p1147_p6 = por %p1146_p5, %p1145_p4 }
   0xf   :  { %p1148_p7 = pnand %p1147_p6, %p1141_p3 }
  0x11   :  { %1151 = shalt.err (!%p1148_p7)
}
  0x12   :  { %41 = dma.hbm_to_vmem [thread:$0]  %s1320_s1, 128, %s39_s13, [#allocation7]  }
  0x13   :  { %s1152_s28 = scalar_lea.hbm %s1319_s0, 384 }
  0x14   :  { %p1153_p8 = scmp.ne.s32.totalorder %s1319_s0, %s1152_s28  ;;  %p1156_p9 = scmp.lt.u32.totalorder %s1152_s28, %s1319_s0 }
  0x16   :  { %p1158_p10 = pnand %p1156_p9, %p1153_p8 }
  0x18   :  { %1161 = shalt.err (!%p1158_p10)
}
  0x19   :  { %s1162_s6 = scalar_lea.vmem %s24_s15, 384  ;;  %p1167_p12 = scmp.lt.s32.totalorder %s24_s15, %s24_s15 }
  0x1a   :  { %p1163_p11 = scmp.ne.s32.totalorder %s24_s15, %s1162_s6  ;;  %p1168_p13 = scmp.lt.s32.totalorder %s1162_s6, %s1162_s6 }
  0x1c   :  { %p1169_p0 = por %p1168_p13, %p1167_p12 }
  0x1e   :  { %p1170_p1 = pnand %p1169_p0, %p1163_p11 }
  0x20   :  { %1173 = shalt.err (!%p1170_p1)
}
  0x21   :  { %26 = dma.hbm_to_vmem [thread:$0]  %s1319_s0, 384, %s24_s15, [#allocation4]  }
  0x22   :  { %s1226_s8 = smov [#allocation8]   ;;  %s1174_s12 = scalar_lea.hbm %s1321_s2, 9216 }
  0x23   :  { %s47_s9 = sshll.u32 %s1226_s8, 4  ;;  %p1175_p2 = scmp.ne.s32.totalorder %s1321_s2, %s1174_s12  ;;  %s48_s9 = int_to_ptr.vmem [resolvable:$true] %s47_s9 }
  0x24   :  { %p1178_p3 = scmp.lt.u32.totalorder %s1174_s12, %s1321_s2 }
  0x26   :  { %p1180_p4 = pnand %p1178_p3, %p1175_p2 }
  0x28   :  { %1183 = shalt.err (!%p1180_p4)
}
  0x29   :  { %s1184_s18 = scalar_lea.vmem %s48_s9, 9216  ;;  %p1189_p6 = scmp.lt.s32.totalorder %s48_s9, %s48_s9 }
  0x2a   :  { %p1185_p5 = scmp.ne.s32.totalorder %s48_s9, %s1184_s18  ;;  %p1190_p7 = scmp.lt.s32.totalorder %s1184_s18, %s1184_s18 }
  0x2c   :  { %p1191_p8 = por %p1190_p7, %p1189_p6 }
  0x2e   :  { %p1192_p9 = pnand %p1191_p8, %p1185_p5 }
  0x30   :  { %1195 = shalt.err (!%p1192_p9)
}
  0x31   :  { %s1227_s0 = smov 192   ;;  %s1228_s15 = smov 12  }
  0x32   :  { %53 = dma.hbm_to_vmem [thread:$0]  %s1321_s2, 9216, %s48_s9, [#allocation7], %s1227_s0, %s1227_s0, %s1228_s15  }
  0x33   :  { %1218 = dma.done.wait [#allocation4], 384  }
  0x34   :  { %1219 = vsyncadd [#allocation4], 4294966912 }
  0x35   :  { %1220 = dma.done.wait [#allocation7], 9344  }
  0x36   :  { %1221 = vsyncadd [#allocation7], 4294957952  ;;  %v1034_v0 = vld [vmem:[#allocation8 + $0x4] ss:$12 sps:$4 sm:$0xff]   ;;  %v1036_v1 = vld [vmem:[#allocation8] ss:$12 sps:$4 sm:$0xff]  }
  0x37   :  { %632 = vmatprep.subr.bf16.mxu0 %v1034_v0  ;;  %v1037_v2 = vld [vmem:[#allocation8 + $0x1c] ss:$12 sps:$4 sm:$0xff]   ;;  %v1040_v4 = vld [vmem:[#allocation8 + $0x18] ss:$12 sps:$4 sm:$0xff]   ;;  %v1042_v6 = vld [vmem:[#allocation8 + $0x34] ss:$12 sps:$4 sm:$0xff]  }
  0x38   :  { %633 = vmatpush1.bf16.msra.mxu0 %v1036_v1  ;;  %v1039_v3 = vld [vmem:[#allocation8 + $0xc8] ss:$12 sps:$4 sm:$0xff]   ;;  %v1044_v7 = vld [vmem:[#allocation8 + $0xe0] ss:$12 sps:$4 sm:$0xff]   ;;  %v1045_v8 = vld [vmem:[#allocation8 + $0x30] ss:$12 sps:$4 sm:$0xff]  }
  0x39   :  { %634 = vmatprep.subr.bf16.mxu0 %v1037_v2  ;;  %v1041_v5 = vld [vmem:[#allocation8 + $0x8] ss:$12 sps:$4 sm:$0xff]   ;;  %961 = vmatprep.subr.bf16.mxu1 %v1039_v3  ;;  %v1046_v9 = vld [vmem:[#allocation8 + $0x20] ss:$12 sps:$4 sm:$0xff]   ;;  %v1049_v11 = vld [vmem:[#allocation8 + $0xf8] ss:$12 sps:$4 sm:$0xff]  }
  0x3a   :  { %962 = vmatpush3.bf16.msra.mxu1 %v1041_v5  ;;  %v1047_v10 = vld [vmem:[#allocation8 + $0x4c] ss:$12 sps:$4 sm:$0xff]   ;;  %v1050_v12 = vld [vmem:[#allocation8 + $0x48] ss:$12 sps:$4 sm:$0xff]   ;;  %v1052_v14 = vld [vmem:[#allocation8 + $0x64] ss:$12 sps:$4 sm:$0xff]  }
  0x3b   :  { %963 = vmatprep.subr.bf16.mxu1 %v1044_v7  ;;  %v1051_v13 = vld [vmem:[#allocation8 + $0x38] ss:$12 sps:$4 sm:$0xff]   ;;  %v1054_v15 = vld [vmem:[#allocation8 + $0x110] ss:$12 sps:$4 sm:$0xff]   ;;  %v1055_v17 = vld [vmem:[#allocation8 + $0x60] ss:$12 sps:$4 sm:$0xff]  }
  0x3c   :  { %635 = vmatpush1.bf16.msra.mxu0 %v1040_v4  ;;  %v1056_v16 = vld [vmem:[#allocation8 + $0x50] ss:$12 sps:$4 sm:$0xff]   ;;  %v1059_v19 = vld [vmem:[#allocation8 + $0x128] ss:$12 sps:$4 sm:$0xff]   ;;  %v1060_v20 = vld [vmem:[#allocation8 + $0x78] ss:$12 sps:$4 sm:$0xff]  }
  0x3d   :  { %636 = vmatprep.subr.bf16.mxu0 %v1042_v6  ;;  %v1057_v18 = vld [vmem:[#allocation8 + $0x7c] ss:$12 sps:$4 sm:$0xff]   ;;  %v1064_v22 = vld [vmem:[#allocation8 + $0x140] ss:$12 sps:$4 sm:$0xff]   ;;  %v1069_v26 = vld [vmem:[#allocation8 + $0x158] ss:$12 sps:$4 sm:$0xff]  }
  0x3e   :  { %964 = vmatpush3.bf16.msra.mxu1 %v1046_v9  ;;  %v1061_v21 = vld [vmem:[#allocation8 + $0x68] ss:$12 sps:$4 sm:$0xff]   ;;  %v1066_v24 = vld [vmem:[#allocation8 + $0x80] ss:$12 sps:$4 sm:$0xff]   ;;  %v1065_v25 = vld [vmem:[#allocation8 + $0x90] ss:$12 sps:$4 sm:$0xff]  }
  0x3f   :  { %965 = vmatprep.subr.bf16.mxu1 %v1049_v11  ;;  %v1062_v23 = vld [vmem:[#allocation8 + $0x94] ss:$12 sps:$4 sm:$0xff]   ;;  %v1067_v27 = vld [vmem:[#allocation8 + $0xac] ss:$12 sps:$4 sm:$0xff]   ;;  %v1074_v30 = vld [vmem:[#allocation8 + $0x170] ss:$12 sps:$4 sm:$0xff]  }
  0x40   :  { %637 = vmatpush1.bf16.msra.mxu0 %v1045_v8  ;;  %v1070_v28 = vld [vmem:[#allocation8 + $0xa8] ss:$12 sps:$4 sm:$0xff]   ;;  %v1071_v29 = vld [vmem:[#allocation8 + $0x98] ss:$12 sps:$4 sm:$0xff]   ;;  %v1076_v33 = vld [vmem:[#allocation8 + $0xb0] ss:$12 sps:$4 sm:$0xff]  }
  0x41   :  { %638 = vmatprep.subr.bf16.mxu0 %v1047_v10  ;;  %v1072_v31 = vld [vmem:[#allocation8 + $0xc4] ss:$12 sps:$4 sm:$0xff]   ;;  %v144_v32 = vld [vmem:[#allocation6] sm:$0xff]  ;;  %v1075_v35 = vld [vmem:[#allocation8 + $0xc0] ss:$12 sps:$4 sm:$0xff]   ;;  %v1229_v39 = vmov 0.0  }
  0x42   :  { %966 = vmatpush3.bf16.msra.mxu1 %v1051_v13  ;;  %v1290_v34 = vpack.c.bf16 %v144_v32, %v144_v32  ;;  %v1077_v36 = vld [vmem:[#allocation8 + $0xdc] ss:$12 sps:$4 sm:$0xff]   ;;  %v1079_v40 = vld [vmem:[#allocation8 + $0xd8] ss:$12 sps:$4 sm:$0xff]   ;;  %v1081_v43 = vld [vmem:[#allocation8 + $0xf4] ss:$12 sps:$4 sm:$0xff]  }
  0x43   :  { %967 = vmatprep.subr.bf16.mxu1 %v1054_v15  ;;  %v1080_v42 = vld [vmem:[#allocation8 + $0x188] ss:$12 sps:$4 sm:$0xff]   ;;  %v1083_v44 = vld [vmem:[#allocation8 + $0xf0] ss:$12 sps:$4 sm:$0xff]   ;;  %v1084_v45 = vld [vmem:[#allocation8 + $0x1a0] ss:$12 sps:$4 sm:$0xff]  }
  0x44   :  { %639 = vmatpush1.bf16.msra.mxu0 %v1050_v12  ;;  %v146_v37 = vunpack.c.l.bf16 %v1290_v34  ;;  %v1085_v46 = vld [vmem:[#allocation8 + $0x10c] ss:$12 sps:$4 sm:$0xff]   ;;  %vm1230_vm0 = vmmov 0   ;;  %v1087_v47 = vld [vmem:[#allocation8 + $0x108] ss:$12 sps:$4 sm:$0xff]   ;;  %v1231_v5 = vmov 0  }
  0x45   :  { %640 = vmatprep.subr.bf16.mxu0 %v1052_v14  ;;  %v1088_v48 = vld [vmem:[#allocation8 + $0x1b8] ss:$12 sps:$4 sm:$0xff]   ;;  %v1091_v50 = vld [vmem:[#allocation8 + $0x120] ss:$12 sps:$4 sm:$0xff]   ;;  %v1092_v51 = vld [vmem:[#allocation8 + $0x1d0] ss:$12 sps:$4 sm:$0xff]  }
  0x46   :  { %968 = vmatpush3.bf16.msra.mxu1 %v1056_v16  ;;  %v147_v38 = vsub.f32 %v144_v32, %v146_v37  ;;  %v1089_v49 = vld [vmem:[#allocation8 + $0x124] ss:$12 sps:$4 sm:$0xff]   ;;  %v1093_v52 = vld [vmem:[#allocation8 + $0x13c] ss:$12 sps:$4 sm:$0xff]   ;;  %v1097_v55 = vld [vmem:[#allocation8 + $0x154] ss:$12 sps:$4 sm:$0xff]  }
  0x47   :  { %969 = vmatprep.subr.bf16.mxu1 %v1059_v19  ;;  %v1095_v53 = vld [vmem:[#allocation8 + $0x138] ss:$12 sps:$4 sm:$0xff]   ;;  %v1096_v54 = vld [vmem:[#allocation8 + $0x1e8] ss:$12 sps:$4 sm:$0xff]   ;;  %v1099_v56 = vld [vmem:[#allocation8 + $0x150] ss:$12 sps:$4 sm:$0xff]  }
  0x48   :  { %641 = vmatpush1.bf16.msra.mxu0 %v1055_v17  ;;  %v148_v41 = vpack.c.bf16 %v147_v38, %v147_v38  ;;  %v1100_v57 = vld [vmem:[#allocation8 + $0x200] ss:$12 sps:$4 sm:$0xff]   ;;  %v1103_v60 = vld [vmem:[#allocation8 + $0x168] ss:$12 sps:$4 sm:$0xff]   ;;  %v1104_v61 = vld [vmem:[#allocation8 + $0x218] ss:$12 sps:$4 sm:$0xff]  }
  0x49   :  { %642 = vmatprep.subr.bf16.mxu0 %v1057_v18  ;;  %v1101_v58 = vld [vmem:[#allocation8 + $0x16c] ss:$12 sps:$4 sm:$0xff]   ;;  %v1107_v62 = vld [vmem:[#allocation8 + $0x184] ss:$12 sps:$4 sm:$0xff]   ;;  %v1111_v2 = vld [vmem:[#allocation8 + $0x19c] ss:$12 sps:$4 sm:$0xff]  }
  0x4a   :  { %970 = vmatpush3.bf16.msra.mxu1 %v1061_v21  ;;  %746 = vmatprep.mubr.bf16.mxu1 %v148_v41  ;;  %v149_v59 = vunpack.c.l.bf16 %v148_v41  ;;  %v1105_v63 = vld [vmem:[#allocation8 + $0x180] ss:$12 sps:$4 sm:$0xff]   ;;  %v1108_v1 = vld [vmem:[#allocation8 + $0x230] ss:$12 sps:$4 sm:$0xff]   ;;  %v1109_v3 = vld [vmem:[#allocation8 + $0x198] ss:$12 sps:$4 sm:$0xff]  }
  0x4b   :  { %971 = vmatprep.subr.bf16.mxu1 %v1064_v22  ;;  %664 = vmatprep.mubr.bf16.mxu0 %v148_v41  ;;  %v1114_v6 = vld [vmem:[#allocation8 + $0x1b4] ss:$12 sps:$4 sm:$0xff]   ;;  %v1112_v7 = vld [vmem:[#allocation8 + $0x1b0] ss:$12 sps:$4 sm:$0xff]   ;;  %v1117_v8 = vld [vmem:[#allocation8 + $0x1cc] ss:$12 sps:$4 sm:$0xff]  }
  0x4c   :  { %643 = vmatpush1.bf16.msra.mxu0 %v1060_v20  ;;  %v150_v0 = vsub.f32 %v147_v38, %v149_v59  ;;  %v1115_v9 = vld [vmem:[#allocation8 + $0x1c8] ss:$12 sps:$4 sm:$0xff]   ;;  %v1120_v10 = vld [vmem:[#allocation8 + $0x1e4] ss:$12 sps:$4 sm:$0xff]   ;;  %v1118_v11 = vld [vmem:[#allocation8 + $0x1e0] ss:$12 sps:$4 sm:$0xff]  }
  0x4d   :  { %644 = vmatprep.subr.bf16.mxu0 %v1062_v23  ;;  %v1123_v12 = vld [vmem:[#allocation8 + $0x1fc] ss:$12 sps:$4 sm:$0xff]   ;;  %v1121_v13 = vld [vmem:[#allocation8 + $0x1f8] ss:$12 sps:$4 sm:$0xff]   ;;  %v1126_v14 = vld [vmem:[#allocation8 + $0x214] ss:$12 sps:$4 sm:$0xff]   ;;  %v77_v23 = vlaneseq }
  0x4e   :  { %972 = vmatpush3.bf16.msra.mxu1 %v1066_v24  ;;  %v151_v4 = vpack.c.bf16 %v150_v0, %v150_v0  ;;  %v1124_v15 = vld [vmem:[#allocation8 + $0x210] ss:$12 sps:$4 sm:$0xff]   ;;  %v1129_v16 = vld [vmem:[#allocation8 + $0x22c] ss:$12 sps:$4 sm:$0xff]   ;;  %v1127_v17 = vld [vmem:[#allocation8 + $0x228] ss:$12 sps:$4 sm:$0xff]  }
  0x4f   :  { %973 = vmatprep.subr.bf16.mxu1 %v1069_v26  ;;  %v78_v24 = vand.u32 127, %v77_v23  ;;  %s1233_s2 = smov [#allocation9]  }
  0x50   :  { %645 = vmatpush1.bf16.msra.mxu0 %v1065_v25  ;;  %s872_s21 = sshll.u32 %s1233_s2, 4  ;;  %s873_s21 = int_to_ptr.vmem [resolvable:$true] %s872_s21 }
  0x51   :  { %646 = vmatprep.subr.bf16.mxu0 %v1067_v27  ;;  %v80_v25 = vadd.s32 256, %v78_v24  ;;  %v79_v26 = vadd.s32 128, %v78_v24  ;;  %s1196_s23 = scalar_lea.vmem %s873_s21, 128  ;;  %p1201_p11 = scmp.lt.s32.totalorder %s873_s21, %s873_s21 }
  0x52   :  { %974 = vmatpush3.bf16.msra.mxu1 %v1071_v29  ;;  %p1197_p10 = scmp.ne.s32.totalorder %s873_s21, %s1196_s23  ;;  %p1202_p12 = scmp.lt.s32.totalorder %s1196_s23, %s1196_s23 }
  0x53   :  { %975 = vmatprep.subr.bf16.mxu1 %v1074_v30  ;;  %v1298_v29 = vmul.u32.u64.low 2863311531, %v78_v24  ;;  %v1299_v30 = vmul.u32.u64.high 2863311531, %v78_v24, %v1298_v29 }
  0x54   :  { %647 = vmatpush1.bf16.msra.mxu0 %v1070_v28  ;;  %v1295_v27 = vmul.u32.u64.low 2863311531, %v80_v25  ;;  %v1296_v28 = vmul.u32.u64.high 2863311531, %v80_v25, %v1295_v27  ;;  %p1203_p13 = por %p1202_p12, %p1201_p11 }
  0x55   :  { %648 = vmatprep.subr.bf16.mxu0 %v1072_v31  ;;  %v1301_v31 = vmul.u32.u64.low 2863311531, %v79_v26  ;;  %v1302_v32 = vmul.u32.u64.high 2863311531, %v79_v26, %v1301_v31 }
  0x56   :  { %976 = vmatpush3.bf16.msra.mxu1 %v1076_v33  ;;  %v109_v33 = vshrl.u32 %v1296_v28, 1  ;;  %p1204_p0 = pnand %p1203_p13, %p1197_p10 }
  0x57   :  { %992 = vmatprep.subr.bf16.mxu1 %v1229_v39 }
  0x58   :  { %649 = vmatpush1.bf16.msra.mxu0 %v1075_v35  ;;  %v98_v35 = vshrl.u32 %v1302_v32, 1 }
  0x59   :  { %650 = vmatprep.subr.bf16.mxu0 %v1077_v36  ;;  %747 = vmatmul.mubr.bf16.vlgmr.msra.gmra.mrb[0].mxu1 %v1290_v34  ;;  %v110_v36 = vmul.u32 3, %v109_v33 }
  0x5a   :  { %993 = vmatpush3.bf16.msra.mxu1 %v1080_v42  ;;  %1008 = vmatprep.mubr.msk.bf16.mxu1 %vm1230_vm0, %v1229_v39  ;;  %v99_v41 = vmul.u32 3, %v98_v35 }
  0x5b   :  { %994 = vmatprep.subr.bf16.mxu1 %v1229_v39 }
  0x5c   :  { %651 = vmatpush1.bf16.msra.mxu0 %v1079_v40 }
  0x5d   :  { %652 = vmatprep.subr.bf16.mxu0 %v1081_v43 }
  0x5e   :  { %995 = vmatpush3.bf16.msra.mxu1 %v1084_v45 }
  0x5f   :  { %996 = vmatprep.subr.bf16.mxu1 %v1229_v39 }
  0x60   :  { %653 = vmatpush1.bf16.msra.mxu0 %v1083_v44  ;;  %v111_v44 = vsub.s32 %v80_v25, %v110_v36 }
  0x61   :  { %654 = vmatprep.subr.bf16.mxu0 %v1085_v46  ;;  %v100_v46 = vsub.s32 %v79_v26, %v99_v41 }
  0x62   :  { %997 = vmatpush3.bf16.msra.mxu1 %v1088_v48  ;;  %vm116_vm1 = vcmp.ne.s32.totalorder %v111_v44, 0  ;;  %vm119_vm2 = vcmp.lt.s32.totalorder %v111_v44, 0 }
  0x63   :  { %998 = vmatprep.subr.bf16.mxu1 %v1229_v39  ;;  %vm115_vm5 = vcmp.ne.s32.totalorder %v100_v46, 0  ;;  %vm118_vm6 = vcmp.lt.s32.totalorder %v100_v46, 0  ;;  %vm122_vm7 = vmand %vm119_vm2, %vm116_vm1  ;;  %v124_v48 = vadd.s32 3, %v100_v46 }
  0x64   :  { %655 = vmatpush1.bf16.msra.mxu0 %v1087_v47  ;;  %vm121_vm9 = vmand %vm118_vm6, %vm115_vm5 }
  0x65   :  { %656 = vmatprep.subr.bf16.mxu0 %v1089_v49  ;;  %v125_v49 = vadd.s32 3, %v111_v44 }
  0x66   :  { %999 = vmatpush3.bf16.msra.mxu1 %v1092_v51  ;;  %v127_v51 = vsel %vm121_vm9, %v124_v48, %v100_v46 }
  0x67   :  { %1000 = vmatprep.subr.bf16.mxu1 %v1229_v39  ;;  %vm130_vm11 = vcmp.eq.s32.totalorder %v127_v51, 0  ;;  %vm136_vm14 = vcmp.eq.s32.totalorder %v127_v51, 1 }
  0x68   :  { %657 = vmatpush1.bf16.msra.mxu0 %v1091_v50 }
  0x69   :  { %658 = vmatprep.subr.bf16.mxu0 %v1093_v52  ;;  %v128_v52 = vsel %vm122_vm7, %v125_v49, %v111_v44 }
  0x6a   :  { %1001 = vmatpush3.bf16.msra.mxu1 %v1096_v54  ;;  %vm131_vm12 = vcmp.eq.s32.totalorder %v128_v52, 0  ;;  %vm137_vm15 = vcmp.eq.s32.totalorder %v128_v52, 1 }
  0x6b   :  { %1002 = vmatprep.subr.bf16.mxu1 %v1229_v39 }
  0x6c   :  { %659 = vmatpush1.bf16.msra.mxu0 %v1095_v53  ;;  %v1232_v53 = vmov 0.9  }
  0x6d   :  { %660 = vmatprep.subr.bf16.mxu0 %v1097_v55  ;;  %v133_v55 = vsel %vm130_vm11, 0.1, %v1232_v53 }
  0x6e   :  { %1003 = vmatpush3.bf16.msra.mxu1 %v1100_v57  ;;  %v139_v59 = vsel %vm136_vm14, 0.5, %v133_v55 }
  0x6f   :  { %1004 = vmatprep.subr.bf16.mxu1 %v1229_v39 }
  0x70   :  { %661 = vmatpush1.bf16.msra.mxu0 %v1099_v56  ;;  %v134_v56 = vsel %vm131_vm12, 0.1, %v1232_v53 }
  0x71   :  { %662 = vmatprep.subr.bf16.mxu0 %v1101_v58  ;;  %v796_v58 = vld [vmem:[#allocation3 + $0x10] sm:$0xff] }
  0x72   :  { %1005 = vmatpush3.bf16.msra.mxu1 %v1104_v61  ;;  %v794_v61 = vld [vmem:[#allocation3] sm:$0xff] }
  0x73   :  { %1006 = vmatprep.subr.bf16.mxu1 %v1229_v39 }
  0x74   :  { %663 = vmatpush1.bf16.msra.mxu0 %v1103_v60  ;;  %v140_v60 = vsel %vm137_vm15, 0.5, %v134_v56 }
  0x75   :  { %673 = vmatprep.subr.bf16.mxu0 %v1107_v62 }
  0x76   :  { %1007 = vmatpush3.bf16.msra.mxu1 %v1108_v1 }
  0x77   :  { %665 = vmatmul.mubr.bf16.vlgmr.msra.gmra.mrb[0].mxu0 %v1290_v34  ;;  %v87_v34 = vshrl.u32 %v1299_v30, 1 }
  0x78   :  { %674 = vmatpush1.bf16.msra.mxu0 %v1105_v63  ;;  %705 = vmatprep.mubr.bf16.mxu0 %v1231_v5  ;;  %v795_v63 = vld [vmem:[#allocation3 + $0x8] sm:$0xff] }
  0x79   :  { %675 = vmatprep.subr.bf16.mxu0 %v1111_v2  ;;  %1009 = vmatmul.mubr.bf16.vlgmr.msra.gmra.mrb[4].mxu1 %v151_v4  ;;  %v88_v38 = vmul.u32 3, %v87_v34  ;;  %v887_v2 = vadd.f32 -1.0, %v139_v59 }
  0x7b   :  { %v89_v45 = vsub.s32 %v78_v24, %v88_v38 }
  0x7c   :  { %676 = vmatpush1.bf16.msra.mxu0 %v1109_v3  ;;  %v888_v3 = vadd.f32 -1.0, %v140_v60 }
  0x7d   :  { %677 = vmatprep.subr.bf16.mxu0 %v1114_v6  ;;  %vm114_vm3 = vcmp.ne.s32.totalorder %v89_v45, 0  ;;  %vm117_vm4 = vcmp.lt.s32.totalorder %v89_v45, 0  ;;  %v123_v47 = vadd.s32 3, %v89_v45 }
  0x7e   :  { %vm120_vm8 = vmand %vm117_vm4, %vm114_vm3 }
  0x7f   :  { %v126_v50 = vsel %vm120_vm8, %v123_v47, %v89_v45 }
  0x80   :  { %678 = vmatpush1.bf16.msra.mxu0 %v1112_v7  ;;  %vm129_vm10 = vcmp.eq.s32.totalorder %v126_v50, 0  ;;  %vm135_vm13 = vcmp.eq.s32.totalorder %v126_v50, 1 }
  0x81   :  { %679 = vmatprep.subr.bf16.mxu0 %v1117_v8  ;;  %v132_v54 = vsel %vm129_vm10, 0.1, %v1232_v53 }
  0x82   :  { %v138_v57 = vsel %vm135_vm13, 0.5, %v132_v54 }
  0x83   :  { %v886_v62 = vadd.f32 -1.0, %v138_v57 }
  0x84   :  { %680 = vmatpush1.bf16.msra.mxu0 %v1115_v9 }
  0x85   :  { %681 = vmatprep.subr.bf16.mxu0 %v1120_v10 }
  0x88   :  { %682 = vmatpush1.bf16.msra.mxu0 %v1118_v11 }
  0x89   :  { %683 = vmatprep.subr.bf16.mxu0 %v1123_v12 }
  0x8c   :  { %684 = vmatpush1.bf16.msra.mxu0 %v1121_v13 }
  0x8d   :  { %685 = vmatprep.subr.bf16.mxu0 %v1126_v14 }
  0x90   :  { %686 = vmatpush1.bf16.msra.mxu0 %v1124_v15 }
  0x91   :  { %687 = vmatprep.subr.bf16.mxu0 %v1129_v16 }
  0x94   :  { %688 = vmatpush1.bf16.msra.mxu0 %v1127_v17 }
  0x97   :  { %706 = vmatmul.mubr.bf16.vlgmr.msra.gmra.mrb[0].mxu0 %v151_v4 }
 0x12c   :  { %v977_v18 = vpop.f32.mrb[0].mxu1 }
 0x12d   :  { %v978_v19 = vpop.f32.mrb[1].mxu1 }
 0x12e   :  { %v979_v20 = vadd.f32 %v978_v19, %v977_v18  ;;  %v980_v21 = vpop.f32.mrb[2].mxu1 }
 0x12f   :  { %v981_v22 = vpop.f32.mrb[3].mxu1 }
 0x14c   :  { %v788_v37 = vpop.f32.mrb[4].mxu1 }
 0x14d   :  { %v789_v39 = vadd.f32 %v979_v20, %v788_v37  ;;  %v1010_v40 = vpop.f32.mrb[5].mxu1 }
 0x14e   :  { %v791_v42 = vpop.f32.mrb[6].mxu1 }
 0x14f   :  { %v1011_v43 = vpop.f32.mrb[7].mxu1  ;;  %v799_v0 = vsub.f32 %v789_v39, %v796_v58 }
 0x151   :  { %v802_v13 = vmul.f32 %v888_v3, %v799_v0  ;;  %v805_v14 = vmul.f32 %v799_v0, %v140_v60 }
 0x153   :  { %v808_v17 = vmax.f32 %v802_v13, %v805_v14 }
 0x16a   :  { %v707_v1 = vpop.f32.mrb[0].mxu0 }
 0x16b   :  { %v797_v4 = vsub.f32 %v707_v1, %v794_v61  ;;  %v709_v5 = vpop.f32.mrb[1].mxu0 }
 0x16c   :  { %v798_v6 = vsub.f32 %v709_v5, %v795_v63  ;;  %v711_v7 = vpop.f32.mrb[2].mxu0 }
 0x16d   :  { %v800_v8 = vmul.f32 %v886_v62, %v797_v4  ;;  %v803_v9 = vmul.f32 %v797_v4, %v138_v57  ;;  %v712_v10 = vpop.f32.mrb[3].mxu0 }
 0x16e   :  { %v801_v11 = vmul.f32 %v887_v2, %v798_v6  ;;  %v804_v12 = vmul.f32 %v798_v6, %v139_v59 }
 0x16f   :  { %v806_v15 = vmax.f32 %v800_v8, %v803_v9 }
 0x170   :  { %v807_v16 = vmax.f32 %v801_v11, %v804_v12 }
 0x172   :  { %v853_v18 = vadd.f32 %v807_v16, %v806_v15 }
 0x174   :  { %v854_v19 = vadd.f32 %v853_v18, %v808_v17 }
 0x176   :  { %855 = vadd.xlane.f32.xlu0 %v854_v19 }
 0x203   :  { %v856_v20 = vpop.xlane.xlu0 %855 }
 0x204   :  { %v857_v21 = vrot.slane %v856_v20, 4 }
 0x206   :  { %v858_v22 = vadd.f32 %v857_v21, %v856_v20 }
 0x208   :  { %v859_v23 = vrot.slane %v858_v22, 2 }
 0x20a   :  { %v860_v24 = vadd.f32 %v859_v23, %v858_v22 }
 0x20c   :  { %v861_v25 = vrot.slane %v860_v24, 1 }
 0x20e   :  { %v862_v26 = vadd.f32 %v861_v25, %v860_v24 }
 0x210   :  { %1022 = vpush %v862_v26 }
 0x241   :  { %s1023_s22 = spop %1022 }
 0x242   :  { %v864_v27 = vstv %s1023_s22 }
 0x243   :  { %865 = vst [vmem:[#allocation9] sm:$0xff] %v864_v27 }
 0x244   :  { %1207 = shalt.err (!%p1204_p0)
}
 0x245   :  { %s1208_s26 = scalar_lea.hbm %s1322_s3, 128 }
 0x246   :  { %p1209_p1 = scmp.ne.s32.totalorder %s1322_s3, %s1208_s26  ;;  %p1212_p2 = scmp.lt.u32.totalorder %s1208_s26, %s1322_s3 }
 0x248   :  { %p1214_p3 = pnand %p1212_p2, %p1209_p1 }
 0x24a   :  { %1217 = shalt.err (!%p1214_p3)
}
 0x24b   :  { %875 = dma.vmem_to_hbm [thread:$0]  %s873_s21, 128, %s1322_s3, [#allocation5]  }
 0x24c   :  { %1222 = dma.done.wait [#allocation5], 128  }
 0x24d   :  { %1223 = vsyncadd [#allocation5], 4294967168 }
 0x24e   :  { %879 = vsyncpa [#allocation4], 1 }
 0x24f   :  { %880 = vsyncpa [#allocation7], 1 }
 0x250   :  { %881 = vsyncpa [#allocation5], 1 }

</bundles_post_ra>
